<compile_context>
chip_gen: v7x
topology: tpu7x:2x2x1
jax: 0.10.0
libtpu: 0.0.40
codegen_flags: <defaults>
</compile_context>

<pallas_src>
import numpy as np
import jax
import jax.numpy as jnp
from jax import lax
from jax.experimental import pallas as pl
from jax.experimental.pallas import tpu as pltpu


# ---------------------------------------------------------------------------
# kernel factory (all shape parameters are static Python ints)
# ---------------------------------------------------------------------------
def _make_kernel(c, h, w):
    hw = h * w

    def kernel(x_ref, wt_ref, msk_ref, out_ref):
        x = x_ref[0]                       # (c, hw)  f32, channel-major
        wt = wt_ref[...]                   # (2, 9)   conv taps: row0=avg, row1=max
        msk = msk_ref[...]                 # (9, hw)  zero-padding boundary masks

        # ---- channel mean / max (cross-sublane reduce) ----
        avg = jnp.mean(x, axis=0, keepdims=True)            # (1, hw)
        mx = jnp.max(x, axis=0, keepdims=True)              # (1, hw)
        sm = jnp.concatenate([avg, mx], axis=0)             # (2, hw)

        # ---- 3x3 conv (2 -> 1), stride 1, zero padding 1, via lane rolls ----
        acc = sm * wt[:, 4:5]              # center tap: no shift, no mask
        for dy in (-1, 0, 1):
            for dx in (-1, 0, 1):
                if dy == 0 and dx == 0:
                    continue
                k = (dy + 1) * 3 + (dx + 1)
                shift = (-(dy * w + dx)) % hw      # shifted[p] = sm[p + dy*w + dx]
                sv = pltpu.roll(sm, shift, 1)
                acc = acc + (sv * msk[k:k + 1, :]) * wt[:, k:k + 1]

        y = acc[0:1, :] + acc[1:2, :]      # sum over the 2 input channels
        out_ref[0] = jax.nn.sigmoid(y)     # (1, hw) lane-dense store

    return kernel


# ---------------------------------------------------------------------------
# host-side helpers
# ---------------------------------------------------------------------------
def _make_masks(h, w):
    """(9, H*W) validity masks for a 3x3 neighborhood with zero padding 1."""
    hw = h * w
    yc, xc = np.divmod(np.arange(hw, dtype=np.int64), w)
    msk = np.zeros((9, hw), np.float32)
    for dy in (-1, 0, 1):
        for dx in (-1, 0, 1):
            k = (dy + 1) * 3 + (dx + 1)
            ok = ((xc + dx >= 0) & (xc + dx < w) &
                  (yc + dy >= 0) & (yc + dy < h))
            msk[k] = ok.astype(np.float32)
    return jnp.asarray(msk)


# ---------------------------------------------------------------------------
# wrapper
# ---------------------------------------------------------------------------
def spatial_attention(x_nchw, conv_weight):
    """x_nchw: (B, C, H, W); conv_weight: (1, 2, 3, 3) (PyTorch OIHW layout)."""
    b, c, h, w = x_nchw.shape
    hw = h * w

    # NCHW is already channel-major: flattening the spatial dims is free.
    x = jnp.asarray(x_nchw, jnp.float32).reshape(b, c, hw)
    # tap index k = (dy+1)*3 + (dx+1) == ky*3 + kx  -> plain reshape is correct
    wt = jnp.asarray(conv_weight, jnp.float32).reshape(2, 9)
    msk = _make_masks(h, w)

    kernel = _make_kernel(c, h, w)

    out = pl.pallas_call(
        kernel,
        grid=(b,),
        in_specs=[
            pl.BlockSpec((1, c, hw), lambda i: (i, 0, 0)),
            pl.BlockSpec((2, 9), lambda i: (0, 0)),
            pl.BlockSpec((9, hw), lambda i: (0, 0)),
        ],
        out_specs=pl.BlockSpec((1, 1, hw), lambda i: (i, 0, 0)),
        out_shape=jax.ShapeDtypeStruct((b, 1, hw), jnp.float32),
        compiler_params=pltpu.CompilerParams(
            dimension_semantics=("parallel",)),
    )(x, wt, msk)

    return out.reshape(b, 1, h, w)


# ---------------------------------------------------------------------------
# pure-JAX reference (for verification only)
# ---------------------------------------------------------------------------
def reference_forward(x_nchw, conv_weight):
    x = jnp.asarray(x_nchw, jnp.float32)
    avg = jnp.mean(x, axis=1, keepdims=True)
    mx = jnp.max(x, axis=1, keepdims=True)
    sm = jnp.concatenate([avg, mx], axis=1)                 # (B, 2, H, W)
    y = lax.conv_general_dilated(
        sm, jnp.asarray(conv_weight, jnp.float32),
        window_strides=(1, 1), padding=((1, 1), (1, 1)),
        dimension_numbers=("NCHW", "OIHW", "NCHW"),
        precision=lax.Precision.HIGHEST)
    return jax.nn.sigmoid(y)


if __name__ == "__main__":
    B, C, H, W = 2, 4, 16, 16
    key = jax.random.PRNGKey(0)
    kx, kw = jax.random.split(key)
    x = jax.random.normal(kx, (B, C, H, W), jnp.float32)
    conv_weight = 0.2 * jax.random.normal(kw, (1, 2, 3, 3), jnp.float32)

    out = spatial_attention(x, conv_weight)
    out = jax.block_until_ready(out)
    assert out.shape == (B, 1, H, W)

    ref = reference_forward(x, conv_weight)
    np.testing.assert_allclose(np.asarray(out), np.asarray(ref),
                               atol=1e-4, rtol=1e-4)
    print("KERNEL_OK")
</pallas_src>

<mosaic_0001>
module attributes {stable_mosaic.version = 11 : i64} {
  func.func @kernel(%arg0: i32, %arg1: memref<1x4x256xf32, #tpu.memory_space<vmem>>, %arg2: memref<2x9xf32, #tpu.memory_space<vmem>>, %arg3: memref<9x256xf32, #tpu.memory_space<vmem>>, %arg4: memref<1x1x256xf32, #tpu.memory_space<vmem>>) attributes {dimension_semantics = [#tpu.dimension_semantics<parallel>], iteration_bounds = array<i64: 2>, scalar_prefetch = 0 : i64, scratch_operands = 0 : i64, tpu.core_type = #tpu.core_type<tc>, window_params = [{transform_indices = @transform_0, window_bounds = array<i64: 1, 4, 256>}, {pipeline_mode = #tpu.pipeline_mode<synchronous>, transform_indices = @transform_1, window_bounds = array<i64: 2, 9>}, {pipeline_mode = #tpu.pipeline_mode<synchronous>, transform_indices = @transform_2, window_bounds = array<i64: 9, 256>}, {transform_indices = @transform_3, window_bounds = array<i64: 1, 1, 256>}]} {
    %c0 = arith.constant 0 : index
    %c0_0 = arith.constant 0 : index
    %c0_1 = arith.constant 0 : index
    %0 = vector.load %arg1[%c0, %c0_0, %c0_1] : memref<1x4x256xf32, #tpu.memory_space<vmem>>, vector<1x4x256xf32>
    %1 = vector.shape_cast %0 : vector<1x4x256xf32> to vector<4x256xf32>
    %c0_2 = arith.constant 0 : index
    %c0_3 = arith.constant 0 : index
    %2 = vector.load %arg2[%c0_2, %c0_3] : memref<2x9xf32, #tpu.memory_space<vmem>>, vector<2x9xf32>
    %c0_4 = arith.constant 0 : index
    %c0_5 = arith.constant 0 : index
    %3 = vector.load %arg3[%c0_4, %c0_5] : memref<9x256xf32, #tpu.memory_space<vmem>>, vector<9x256xf32>
    %cst = arith.constant dense<0.000000e+00> : vector<256xf32>
    %4 = vector.multi_reduction <add>, %1, %cst [0] : vector<4x256xf32> to vector<256xf32>
    %5 = vector.shape_cast %4 : vector<256xf32> to vector<1x256xf32>
    %cst_6 = arith.constant 4.000000e+00 : f32
    %6 = vector.broadcast %cst_6 : f32 to vector<1x256xf32>
    %7 = arith.divf %5, %6 : vector<1x256xf32>
    %cst_7 = arith.constant dense<0xFF800000> : vector<256xf32>
    %8 = vector.multi_reduction <maximumf>, %1, %cst_7 [0] : vector<4x256xf32> to vector<256xf32>
    %9 = vector.shape_cast %8 : vector<256xf32> to vector<1x256xf32>
    %10 = tpu.concatenate %7, %9 in 0 : vector<1x256xf32>, vector<1x256xf32> -> vector<2x256xf32>
    %11 = vector.extract_strided_slice %2 {offsets = [0, 4], sizes = [2, 1], strides = [1, 1]} : vector<2x9xf32> to vector<2x1xf32>
    %12 = vector.broadcast %11 : vector<2x1xf32> to vector<2x256xf32>
    %13 = arith.mulf %10, %12 : vector<2x256xf32>
    %c17_i32 = arith.constant 17 : i32
    %14 = tpu.dynamic_rotate %10 by %c17_i32 dim 1 : vector<2x256xf32>, i32 -> vector<2x256xf32>
    %15 = vector.extract_strided_slice %3 {offsets = [0, 0], sizes = [1, 256], strides = [1, 1]} : vector<9x256xf32> to vector<1x256xf32>
    %16 = vector.broadcast %15 : vector<1x256xf32> to vector<2x256xf32>
    %17 = arith.mulf %14, %16 : vector<2x256xf32>
    %18 = vector.extract_strided_slice %2 {offsets = [0, 0], sizes = [2, 1], strides = [1, 1]} : vector<2x9xf32> to vector<2x1xf32>
    %19 = vector.broadcast %18 : vector<2x1xf32> to vector<2x256xf32>
    %20 = arith.mulf %17, %19 : vector<2x256xf32>
    %21 = arith.addf %13, %20 : vector<2x256xf32>
    %c16_i32 = arith.constant 16 : i32
    %22 = tpu.dynamic_rotate %10 by %c16_i32 dim 1 : vector<2x256xf32>, i32 -> vector<2x256xf32>
    %23 = vector.extract_strided_slice %3 {offsets = [1, 0], sizes = [1, 256], strides = [1, 1]} : vector<9x256xf32> to vector<1x256xf32>
    %24 = vector.broadcast %23 : vector<1x256xf32> to vector<2x256xf32>
    %25 = arith.mulf %22, %24 : vector<2x256xf32>
    %26 = vector.extract_strided_slice %2 {offsets = [0, 1], sizes = [2, 1], strides = [1, 1]} : vector<2x9xf32> to vector<2x1xf32>
    %27 = vector.broadcast %26 : vector<2x1xf32> to vector<2x256xf32>
    %28 = arith.mulf %25, %27 : vector<2x256xf32>
    %29 = arith.addf %21, %28 : vector<2x256xf32>
    %c15_i32 = arith.constant 15 : i32
    %30 = tpu.dynamic_rotate %10 by %c15_i32 dim 1 : vector<2x256xf32>, i32 -> vector<2x256xf32>
    %31 = vector.extract_strided_slice %3 {offsets = [2, 0], sizes = [1, 256], strides = [1, 1]} : vector<9x256xf32> to vector<1x256xf32>
    %32 = vector.broadcast %31 : vector<1x256xf32> to vector<2x256xf32>
    %33 = arith.mulf %30, %32 : vector<2x256xf32>
    %34 = vector.extract_strided_slice %2 {offsets = [0, 2], sizes = [2, 1], strides = [1, 1]} : vector<2x9xf32> to vector<2x1xf32>
    %35 = vector.broadcast %34 : vector<2x1xf32> to vector<2x256xf32>
    %36 = arith.mulf %33, %35 : vector<2x256xf32>
    %37 = arith.addf %29, %36 : vector<2x256xf32>
    %c1_i32 = arith.constant 1 : i32
    %38 = tpu.dynamic_rotate %10 by %c1_i32 dim 1 : vector<2x256xf32>, i32 -> vector<2x256xf32>
    %39 = vector.extract_strided_slice %3 {offsets = [3, 0], sizes = [1, 256], strides = [1, 1]} : vector<9x256xf32> to vector<1x256xf32>
    %40 = vector.broadcast %39 : vector<1x256xf32> to vector<2x256xf32>
    %41 = arith.mulf %38, %40 : vector<2x256xf32>
    %42 = vector.extract_strided_slice %2 {offsets = [0, 3], sizes = [2, 1], strides = [1, 1]} : vector<2x9xf32> to vector<2x1xf32>
    %43 = vector.broadcast %42 : vector<2x1xf32> to vector<2x256xf32>
    %44 = arith.mulf %41, %43 : vector<2x256xf32>
    %45 = arith.addf %37, %44 : vector<2x256xf32>
    %c255_i32 = arith.constant 255 : i32
    %46 = tpu.dynamic_rotate %10 by %c255_i32 dim 1 : vector<2x256xf32>, i32 -> vector<2x256xf32>
    %47 = vector.extract_strided_slice %3 {offsets = [5, 0], sizes = [1, 256], strides = [1, 1]} : vector<9x256xf32> to vector<1x256xf32>
    %48 = vector.broadcast %47 : vector<1x256xf32> to vector<2x256xf32>
    %49 = arith.mulf %46, %48 : vector<2x256xf32>
    %50 = vector.extract_strided_slice %2 {offsets = [0, 5], sizes = [2, 1], strides = [1, 1]} : vector<2x9xf32> to vector<2x1xf32>
    %51 = vector.broadcast %50 : vector<2x1xf32> to vector<2x256xf32>
    %52 = arith.mulf %49, %51 : vector<2x256xf32>
    %53 = arith.addf %45, %52 : vector<2x256xf32>
    %c241_i32 = arith.constant 241 : i32
    %54 = tpu.dynamic_rotate %10 by %c241_i32 dim 1 : vector<2x256xf32>, i32 -> vector<2x256xf32>
    %55 = vector.extract_strided_slice %3 {offsets = [6, 0], sizes = [1, 256], strides = [1, 1]} : vector<9x256xf32> to vector<1x256xf32>
    %56 = vector.broadcast %55 : vector<1x256xf32> to vector<2x256xf32>
    %57 = arith.mulf %54, %56 : vector<2x256xf32>
    %58 = vector.extract_strided_slice %2 {offsets = [0, 6], sizes = [2, 1], strides = [1, 1]} : vector<2x9xf32> to vector<2x1xf32>
    %59 = vector.broadcast %58 : vector<2x1xf32> to vector<2x256xf32>
    %60 = arith.mulf %57, %59 : vector<2x256xf32>
    %61 = arith.addf %53, %60 : vector<2x256xf32>
    %c240_i32 = arith.constant 240 : i32
    %62 = tpu.dynamic_rotate %10 by %c240_i32 dim 1 : vector<2x256xf32>, i32 -> vector<2x256xf32>
    %63 = vector.extract_strided_slice %3 {offsets = [7, 0], sizes = [1, 256], strides = [1, 1]} : vector<9x256xf32> to vector<1x256xf32>
    %64 = vector.broadcast %63 : vector<1x256xf32> to vector<2x256xf32>
    %65 = arith.mulf %62, %64 : vector<2x256xf32>
    %66 = vector.extract_strided_slice %2 {offsets = [0, 7], sizes = [2, 1], strides = [1, 1]} : vector<2x9xf32> to vector<2x1xf32>
    %67 = vector.broadcast %66 : vector<2x1xf32> to vector<2x256xf32>
    %68 = arith.mulf %65, %67 : vector<2x256xf32>
    %69 = arith.addf %61, %68 : vector<2x256xf32>
    %c239_i32 = arith.constant 239 : i32
    %70 = tpu.dynamic_rotate %10 by %c239_i32 dim 1 : vector<2x256xf32>, i32 -> vector<2x256xf32>
    %71 = vector.extract_strided_slice %3 {offsets = [8, 0], sizes = [1, 256], strides = [1, 1]} : vector<9x256xf32> to vector<1x256xf32>
    %72 = vector.broadcast %71 : vector<1x256xf32> to vector<2x256xf32>
    %73 = arith.mulf %70, %72 : vector<2x256xf32>
    %74 = vector.extract_strided_slice %2 {offsets = [0, 8], sizes = [2, 1], strides = [1, 1]} : vector<2x9xf32> to vector<2x1xf32>
    %75 = vector.broadcast %74 : vector<2x1xf32> to vector<2x256xf32>
    %76 = arith.mulf %73, %75 : vector<2x256xf32>
    %77 = arith.addf %69, %76 : vector<2x256xf32>
    %78 = vector.extract_strided_slice %77 {offsets = [0, 0], sizes = [1, 256], strides = [1, 1]} : vector<2x256xf32> to vector<1x256xf32>
    %79 = vector.extract_strided_slice %77 {offsets = [1, 0], sizes = [1, 256], strides = [1, 1]} : vector<2x256xf32> to vector<1x256xf32>
    %80 = arith.addf %78, %79 : vector<1x256xf32>
    %81 = arith.negf %80 : vector<1x256xf32>
    %82 = math.exp %81 : vector<1x256xf32>
    %cst_8 = arith.constant 1.000000e+00 : f32
    %83 = vector.broadcast %cst_8 : f32 to vector<1x256xf32>
    %84 = arith.addf %83, %82 : vector<1x256xf32>
    %85 = arith.divf %83, %84 : vector<1x256xf32>
    %c0_9 = arith.constant 0 : index
    %c0_10 = arith.constant 0 : index
    %c0_11 = arith.constant 0 : index
    %86 = vector.load %arg4[%c0_9, %c0_10, %c0_11] : memref<1x1x256xf32, #tpu.memory_space<vmem>>, vector<1x1x256xf32>
    %87 = vector.shape_cast %86 : vector<1x1x256xf32> to vector<1x256xf32>
    %88 = vector.shape_cast %85 : vector<1x256xf32> to vector<1x1x256xf32>
    tpu.vector_store %arg4[%c0_9, %c0_10, %c0_11], %88 {strides = array<i32>} : memref<1x1x256xf32, #tpu.memory_space<vmem>>, vector<1x1x256xf32>,
    return
  }
  func.func @transform_0(%arg0: i32) -> (i32, i32, i32) {
    %c0_i32 = arith.constant 0 : i32
    %c0_i32_0 = arith.constant 0 : i32
    %c0_i32_1 = arith.constant 0 : i32
    return %arg0, %c0_i32, %c0_i32_0 : i32, i32, i32
  }
  func.func @transform_1(%arg0: i32) -> (i32, i32) {
    %c0_i32 = arith.constant 0 : i32
    %c0_i32_0 = arith.constant 0 : i32
    %c0_i32_1 = arith.constant 0 : i32
    return %c0_i32, %c0_i32_0 : i32, i32
  }
  func.func @transform_2(%arg0: i32) -> (i32, i32) {
    %c0_i32 = arith.constant 0 : i32
    %c0_i32_0 = arith.constant 0 : i32
    %c0_i32_1 = arith.constant 0 : i32
    return %c0_i32, %c0_i32_0 : i32, i32
  }
  func.func @transform_3(%arg0: i32) -> (i32, i32, i32) {
    %c0_i32 = arith.constant 0 : i32
    %c0_i32_0 = arith.constant 0 : i32
    %c0_i32_1 = arith.constant 0 : i32
    return %arg0, %c0_i32, %c0_i32_0 : i32, i32, i32
  }
}

</mosaic_0001>

<bundles_post_ra>
// kernel: tpu_custom_call.1
= control target key start
LH: loop header
LB: loop body
LE: loop exit
PB: predicated region body
PF: predicated region fallthrough
CT: control target
= control target key end

     0   :  { %8 = vsyncpa [#allocation3], 0  ;;  %s1195_s0 = inlined_call_operand.hbm [shape: f32[2,4,256], index: 0, kind: input, shape index: {}]   ;;  %s1196_s1 = inlined_call_operand.vmem [shape: f32[2,9], index: 1, kind: input, shape index: {}]   ;;  %s1197_s2 = inlined_call_operand.hbm [shape: f32[9,256], index: 2, kind: input, shape index: {}]   ;;  %s1198_s3 = inlined_call_operand.hbm [shape: f32[2,1,256], index: 3, kind: output, shape index: {}]  }
   0x1   :  { %10 = vsyncpa [#allocation3 + $0x1], 0 }
   0x2   :  { %11 = vsyncpa [#allocation6], 0 }
   0x3   :  { %12 = vsyncpa [#allocation4], 0 }
   0x4   :  { %14 = vsyncpa [#allocation4 + $0x1], 0  ;;  %s883_s12 = smov 0   ;;  %s885_s13 = smov 0  }
   0x5   :  { %s887_s14 = smov 0   ;;  %s889_s15 = smov 0  }
   0x6 LB: > { %s904_s16 = sadd.s32 4294967295, %s838_s15   ;;  %s593_s17 = sadd.s32 4294967294, %s838_s15   ;;  %s838_s15 = sphi %s889_s15, %s1218_s15   ;;  %s834_s14 = sphi %s887_s14, %s1217_s14   ;;  %s830_s13 = sphi %s885_s13, %s1216_s13   ;;  %s826_s12 = sphi %s883_s12, %s1215_s12  }
   0x7   : > { %p40_p0 = scmp.ne.s32.totalorder %s830_s13, %s826_s12  ;;  %p1199_p1 = scmp.eq.s32.totalorder %s904_s16, 0 }
   0x8   : > { %p112_p3 = scmp.eq.s32.totalorder %s593_s17, 1  ;;  %p594_p5 = scmp.ge.s32.totalorder %s838_s15, 1 }
   0x9   : > { %p913_p4 = por %p1199_p1, %p40_p0  ;;  %p119_p7 = scmp.lt.s32.totalorder %s838_s15, 3 }
   0xa   : > { %p918_p6 = por %p112_p3, %p40_p0  ;;  %s840_s21 = smov [#allocation5]  }
   0xb   : > { %s1202_s18 = scalar_select %p913_p4, 1, 0 }
   0xc   : > { %s1203_s19 = scalar_select %p918_p6, 1, 0 }
   0xd   : > { %p923_p8 = pnand %p594_p5, %p119_p7  ;;  %s134_s22 = sshll.u32 %s840_s21, 4  ;;  %s927_s22 = int_to_ptr.vmem [resolvable:$true] %s134_s22 }
   0xe   : > { %s939_s24 = sadd.s32 1, %s838_s15   ;;  %s27_s25 = sadd.s32 1, %s834_s14 }
   0xf   : > { %s1204_s20 = scalar_select %p923_p8, 1, 0 }
  0x10   : > { %p623_p9 = pneg %p923_p8  ;;  %s24_s26 = ssub.s32 %s838_s15, %s939_s24 }
  0x11   : > { %s710_s29 = scalar_lea.hbm %s1197_s2, 512 }
  0x12   : > { %p934_p11 = pnand %p623_p9, %p1199_p1  ;;  %p711_p12 = scmp.ne.s32.totalorder %s1197_s2, %s710_s29 }
  0x13   : > { %p717_p5 = scmp.lt.u32.totalorder %s710_s29, %s1197_s2 }
  0x14   : > { %p712_p13 = pneg %p934_p11 }
  0x16   : > { %p713_p0 = pnand %p712_p13, %p711_p12 }
  0x18   : > { %p714_p3 = pneg %p713_p0 }
  0x1a   : > { %p719_p7 = pnand %p717_p5, %p714_p3 }
  0x1c   : > { %722 = shalt.err (!%p719_p7)
}
  0x1d   : > { %s723_s7 = scalar_lea.vmem %s927_s22, 512  ;;  %p731_p2 = scmp.lt.s32.totalorder %s927_s22, %s927_s22 }
  0x1e   : > { %p724_p9 = scmp.ne.s32.totalorder %s927_s22, %s723_s7  ;;  %p732_p6 = scmp.lt.s32.totalorder %s723_s7, %s723_s7 }
  0x20   : > { %p726_p10 = pnand %p724_p9, %p712_p13  ;;  %p733_p4 = por %p732_p6, %p731_p2 }
  0x22   : > { %p727_p1 = pneg %p726_p10 }
  0x24   : > { %p734_p8 = pnand %p733_p4, %p727_p1 }
  0x26   : > { %737 = shalt.err (!%p734_p8)
}
  0x27   : > { %s841_s8 = smov 256   ;;  %s842_s9 = smov 16  }
  0x28   : > { %626 = dma.hbm_to_vmem [thread:$0]  (!%p934_p11), %s1197_s2, 512, %s927_s22, [#allocation6], %s841_s8, %s841_s8, %s842_s9  }
  0x29   : > { %p25_p2 = scmp.eq.s32.totalorder %s24_s26, 0  ;;  %p34_p1 = scmp.ne.s32.totalorder %s834_s14, %s830_s13 }
  0x2a   : > { %p35_p4 = scmp.eq.s32.totalorder %s838_s15, 0  ;;  %p636_p6 = scmp.lt.s32.totalorder %s838_s15, 2 }
  0x2b   : > { %s970_s17 = scalar_select %p25_p2, %s834_s14, %s27_s25  }
  0x2c   : > { %p36_p8 = por %p35_p4, %p34_p1  ;;  %p1206_p10 = scmp.eq.s32.totalorder %s904_s16, 1 }
  0x2d   : > { %s148_s27 = sand.u32 1, %s834_s14   ;;  %s613_s28 = sshll.u32 %s838_s15, 7 }
  0x2e   : > { %p974_p12 = por %p1206_p10, %p34_p1  ;;  %s597_s29 = sshll.u32 %s148_s27, 3 }
  0x2f   : > { %s983_s4 = scalar_lea.hbm %s1195_s0, %s613_s28  ;;  %s152_s22 = scalar_lea.vmem [#allocation2], %s597_s29 }
  0x30   : > { %s160_s25 = sshll.u32 %s152_s22, 4  ;;  %p985_p11 = pnand %p636_p6, %p36_p8  ;;  %s989_s25 = int_to_ptr.vmem [resolvable:$true] %s160_s25 }
  0x31   : > { %s149_s5 = scalar_lea.sflag [#allocation3], %s148_s27  ;;  %s738_s6 = scalar_lea.hbm %s983_s4, 128 }
  0x32   : > { %p739_p13 = scmp.ne.s32.totalorder %s983_s4, %s738_s6  ;;  %p740_p0 = pneg %p985_p11 }
  0x33   : > { %s743_s9 = scalar_lea.hbm %s1195_s0, 256  ;;  %p744_p7 = scmp.lt.u32.totalorder %s983_s4, %s1195_s0 }
  0x34   : > { %p741_p3 = pnand %p740_p0, %p739_p13  ;;  %p745_p9 = scmp.lt.u32.totalorder %s743_s9, %s738_s6 }
  0x35   : > { %p747_p1 = scmp.lt.u32.totalorder %s738_s6, %s983_s4 }
  0x36   : > { %p742_p5 = pneg %p741_p3  ;;  %p746_p2 = por %p745_p9, %p744_p7 }
  0x38   : > { %p748_p4 = por %p747_p1, %p746_p2 }
  0x3a   : > { %p749_p6 = pnand %p748_p4, %p742_p5 }
  0x3c   : > { %752 = shalt.err (!%p749_p6)
}
  0x3d   : > { %s753_s27 = scalar_lea.vmem %s989_s25, 128  ;;  %s843_s28 = smov [#allocation2]  }
  0x3e   : > { %p754_p8 = scmp.ne.s32.totalorder %s989_s25, %s753_s27  ;;  %s758_s29 = sshll.u32 %s843_s28, 4  ;;  %s759_s29 = int_to_ptr.vmem [resolvable:$false] %s758_s29 }
  0x3f   : > { %s760_s23 = scalar_lea.vmem %s759_s29, 256  ;;  %p761_p3 = scmp.lt.s32.totalorder %s989_s25, %s759_s29 }
  0x40   : > { %p756_p10 = pnand %p754_p8, %p740_p0  ;;  %p762_p7 = scmp.lt.s32.totalorder %s760_s23, %s753_s27 }
  0x42   : > { %p757_p13 = pneg %p756_p10  ;;  %p763_p9 = por %p762_p7, %p761_p3 }
  0x44   : > { %p764_p2 = pnand %p763_p9, %p757_p13 }
  0x46   : > { %767 = shalt.err (!%p764_p2)
}
  0x47   : > { %630 = dma.hbm_to_vmem [thread:$0]  (!%p985_p11), %s983_s4, 128, %s989_s25, %s149_s5  }
  0x48   : > { %p1209_p5 = scmp.ne.s32.totalorder %s1204_s20, 0 }
  0x49   : > { %s1019_s30 = sand.u32 (!%p1209_p5), 1, %s830_s13   ;;  %p1210_p0 = scmp.ne.s32.totalorder (!%p1209_p5), %s1202_s18, 0 }
  0x4a   : > { %169 = sbr.rel (%p1209_p5) target bundleno = 333 (0x14d), region = 32  ;;  %s601_s22 = sshll.u32 (!%p1209_p5), %s1019_s30, 3 }
  0x4b   : > { %s172_s6 = scalar_lea.sflag (!%p1209_p5), [#allocation3], %s1019_s30  ;;  %s175_s7 = scalar_lea.vmem (!%p1209_p5), [#allocation2], %s601_s22 }
  0x51   : > { %813 = dma.done.wait (%p1210_p0), %s172_s6, 128  }
  0x52   : > { %815 = vsyncadd (%p1210_p0), %s172_s6, 4294967168  ;;  %p1211_p1 = scmp.eq.s32.totalorder %s904_s16, 0 }
  0x54   : > { %817 = dma.done.wait (%p1211_p1), [#allocation6], 512   ;;  %p1212_p11 = pmov %p1211_p1 }
  0x55   : > { %v844_v0 = vmov 1   ;;  %v845_v1 = vmov 4   ;;  %vm211_vm0 = vcmask 1043456   ;;  %v1034_v2 = vld [vmem:[%s1196_s1] sm:$0x3]  ;;  %v846_v15 = vmov 0  }
  0x56   : > { %819 = vsyncadd (%p1212_p11), [#allocation6], 4294966784  ;;  %694 = vset.pattern.permute.xlu1 %v844_v0  ;;  %692 = vset.pattern.permute.xlu0 %v845_v1  ;;  %v202_v3 = vld [vmem:[%s175_s7] sm:$0xff]  ;;  %v847_v25 = vmov 2   ;;  %vm243_vm1 = vcmask 1040384   ;;  %v848_v33 = vmov 3   ;;  %v257_v53 = vlaneseq }
  0x57   : > { %298 = vperm.xlu1 %694, %v1034_v2   ;;  %248 = vperm.xlu0 %692, %v1034_v2   ;;  %v212_v4 = vsel %vm211_vm0, %v202_v3, 0.0  ;;  %v229_v5 = vsel %vm211_vm0, %v202_v3, -inf  ;;  %v209_v6 = vcombine.high %v202_v3, %v202_v3  ;;  %s849_s18 = smov 17   ;;  %v850_v37 = vmov 5   ;;  %s851_s25 = smov 16   ;;  %v1082_v62 = vld [vmem:[#allocation5] sm:$0xff] }
  0x58   : > { %v213_v7 = vrot.slane %v212_v4, 4  ;;  %v230_v8 = vrot.slane %v229_v5, 4  ;;  %s852_s26 = smov 15   ;;  %v853_v40 = vmov 6   ;;  %v854_v42 = vmov 7   ;;  %s856_s5 = smov 111  }
  0x59   : > { %v219_v9 = vsel %vm211_vm0, %v209_v6, 0.0  ;;  %v236_v10 = vsel %vm211_vm0, %v209_v6, -inf  ;;  %v855_v43 = vmov 8   ;;  %s857_s8 = smov 1   ;;  %s858_s9 = smov 127   ;;  %v1072_v56 = vshrl.u32 %v257_v53, 7 }
  0x5a   : > { %v214_v11 = vadd.f32 %v213_v7, %v212_v4  ;;  %v231_v12 = vmax.f32 %v229_v5, %v230_v8  ;;  %v220_v13 = vrot.slane %v219_v9, 4  ;;  %v237_v14 = vrot.slane %v236_v10, 4  ;;  %s859_s10 = smov 113   ;;  %s860_s11 = smov 112   ;;  %v1084_v63 = vld [vmem:[#allocation5 + $0x8] sm:$0xff] }
  0x5b   : > { %693 = vset.pattern.permute.xlu0 %v846_v15  ;;  %v1077_v58 = vand.u32 127, %v257_v53  ;;  %v264_v60 = vsub.s32 0, %v1072_v56  ;;  %v289_v0 = vsub.s32 1, %v1072_v56  ;;  %v314_v4 = vsub.s32 2, %v1072_v56  ;;  %s603_s27 = sshll.u32 %s1019_s30, 1  ;;  %s614_s28 = sshll.u32 %s904_s16, 5 }
  0x5c   : > { %v215_v16 = vrot.slane %v214_v11, 2  ;;  %v232_v17 = vrot.slane %v231_v12, 2  ;;  %273 = vperm.xlu0 %693, %v1034_v2   ;;  %v221_v18 = vadd.f32 %v220_v13, %v219_v9  ;;  %v238_v19 = vmax.f32 %v236_v10, %v237_v14  ;;  %s201_s29 = scalar_lea.vmem [#allocation7], %s603_s27  ;;  %s1151_s7 = scalar_lea.hbm %s1198_s3, %s614_s28 }
  0x5d   : > { %vm259_vm2 = vcmp.lt.s32.totalorder %v1077_v58, 17  ;;  %v269_v3 = vrot.slane %v1084_v63, %v264_v60  ;;  %vm284_vm3 = vcmp.lt.s32.totalorder %v1077_v58, 16  ;;  %v339_v7 = vsub.s32 3, %v1072_v56  ;;  %s513_s23 = sshll.u32 %s201_s29, 4  ;;  %s499_s20 = scalar_lea.sflag [#allocation4], %s1019_s30  ;;  %s1153_s23 = int_to_ptr.vmem [resolvable:$true] %s513_s23 }
  0x5e   : > { %v216_v20 = vadd.f32 %v215_v16, %v214_v11  ;;  %v233_v21 = vmax.f32 %v231_v12, %v232_v17  ;;  %v222_v22 = vrot.slane %v221_v18, 2  ;;  %v239_v27 = vrot.slane %v238_v19, 2  ;;  %s768_s4 = scalar_lea.vmem %s1153_s23, 32  ;;  %s862_s16 = smov [#allocation7]  }
  0x5f   : > { %v290_v8 = vrot.slane %v1082_v62, %v289_v0  ;;  %v294_v9 = vrot.slane %v1084_v63, %v289_v0  ;;  %vm309_vm4 = vcmp.lt.s32.totalorder %v1077_v58, 15  ;;  %v315_v16 = vrot.slane %v1082_v62, %v314_v4  ;;  %p769_p4 = scmp.ne.s32.totalorder %s1153_s23, %s768_s4 }
  0x60   : > { %v217_v23 = vrot.slane %v216_v20, 1  ;;  %v234_v24 = vrot.slane %v233_v21, 1  ;;  %695 = vset.pattern.permute.xlu0 %v847_v25  ;;  %v223_v26 = vadd.f32 %v222_v22, %v221_v18  ;;  %v240_v32 = vmax.f32 %v238_v19, %v239_v27 }
  0x61   : > { %323 = vperm.xlu0 %695, %v1034_v2   ;;  %v319_v17 = vrot.slane %v1084_v63, %v314_v4  ;;  %vm334_vm5 = vcmp.lt.s32.totalorder %v1077_v58, 1  ;;  %v340_v18 = vrot.slane %v1082_v62, %v339_v7  ;;  %v364_v19 = vsub.s32 5, %v1072_v56  ;;  %p770_p6 = pnand %p769_p4, %p974_p12 }
  0x62   : > { %v218_v28 = vadd.f32 %v217_v23, %v216_v20  ;;  %v235_v29 = vmax.f32 %v233_v21, %v234_v24  ;;  %v224_v31 = vrot.slane %v223_v26, 1  ;;  %v241_v36 = vrot.slane %v240_v32, 1 }
  0x63   : > { %v389_v20 = vsub.s32 6, %v1072_v56  ;;  %vm359_vm6 = vcmp.lt.s32.totalorder %v1077_v58, 127  ;;  %vm384_vm7 = vcmp.lt.s32.totalorder %v1077_v58, 113  ;;  %vm409_vm8 = vcmp.lt.s32.totalorder %v1077_v58, 112  ;;  %p771_p8 = pneg %p770_p6 }
  0x64   : > { %v227_v30 = vmul.f32 0.25, %v218_v28  ;;  %v225_v35 = vadd.f32 %v224_v31, %v223_v26  ;;  %v242_v39 = vmax.f32 %v240_v32, %v241_v36  ;;  %v344_v28 = vrot.slane %v1084_v63, %v339_v7 }
  0x65   : > { %696 = vset.pattern.permute.xlu0 %v848_v33  ;;  %vm434_vm9 = vcmp.lt.s32.totalorder %v1077_v58, 111  ;;  %vm495_vm10 = vcmp.lt.s32.totalorder %v257_v53, 256 }
  0x66   : > { %v1041_v34 = vsel %vm243_vm1, %v227_v30, %v235_v29  ;;  %348 = vperm.xlu0 %696, %v1034_v2   ;;  %v228_v38 = vmul.f32 0.25, %v225_v35 }
  0x67   : > { %253 = vrot.lane.b32.xlu1 %v1041_v34, %s849_s18 }
  0x68   : > { %v1049_v41 = vsel %vm243_vm1, %v228_v38, %v242_v39 }
  0x6a   : > { %697 = vset.pattern.permute.xlu0 %v850_v37  ;;  %v365_v37 = vrot.slane %v1082_v62, %v364_v19 }
  0x6b   : > { %280 = vrot.lane.b32.xlu1 %v1041_v34, %s851_s25  ;;  %373 = vperm.xlu0 %697, %v1034_v2  }
  0x6f   : > { %305 = vrot.lane.b32.xlu1 %v1041_v34, %s852_s26  ;;  %698 = vset.pattern.permute.xlu0 %v853_v40  ;;  %v390_v40 = vrot.slane %v1082_v62, %v389_v20 }
  0x70   : > { %398 = vperm.xlu0 %698, %v1034_v2  }
  0x73   : > { %255 = vrot.lane.b32.xlu1 %v1049_v41, %s849_s18  ;;  %s772_s18 = sshll.u32 %s862_s16, 4  ;;  %s773_s18 = int_to_ptr.vmem [resolvable:$false] %s772_s18 }
  0x74   : > { %699 = vset.pattern.permute.xlu0 %v854_v42  ;;  %p775_p10 = scmp.lt.s32.totalorder %s1153_s23, %s773_s18 }
  0x75   : > { %423 = vperm.xlu0 %699, %v1034_v2  }
  0x77   : > { %282 = vrot.lane.b32.xlu1 %v1049_v41, %s851_s25  ;;  %s774_s25 = scalar_lea.vmem %s773_s18, 64 }
  0x78   : > { %p776_p13 = scmp.lt.s32.totalorder %s774_s25, %s768_s4 }
  0x79   : > { %700 = vset.pattern.permute.xlu0 %v855_v43 }
  0x7a   : > { %448 = vperm.xlu0 %700, %v1034_v2   ;;  %v265_v2 = vrot.slane %v1082_v62, %v264_v60  ;;  %p777_p3 = por %p776_p13, %p775_p10 }
  0x7b   : > { %307 = vrot.lane.b32.xlu1 %v1049_v41, %s852_s26 }
  0x7c   : > { %p778_p7 = pnand %p777_p3, %p771_p8 }
  0x7e   : > { %430 = vrot.lane.b32.xlu0 %v1041_v34, %s856_s5 }
  0x7f   : > { %330 = vrot.lane.b32.xlu1 %v1041_v34, %s857_s8 }
  0x83   : > { %332 = vrot.lane.b32.xlu1 %v1049_v41, %s857_s8 }
  0x87   : > { %355 = vrot.lane.b32.xlu1 %v1041_v34, %s858_s9 }
  0x8b   : > { %357 = vrot.lane.b32.xlu1 %v1049_v41, %s858_s9 }
  0x8f   : > { %380 = vrot.lane.b32.xlu1 %v1041_v34, %s859_s10 }
  0x93   : > { %382 = vrot.lane.b32.xlu1 %v1049_v41, %s859_s10 }
  0x97   : > { %405 = vrot.lane.b32.xlu1 %v1041_v34, %s860_s11 }
  0x9b   : > { %407 = vrot.lane.b32.xlu1 %v1049_v41, %s860_s11 }
  0x9f   : > { %432 = vrot.lane.b32.xlu1 %v1049_v41, %s856_s5 }
  0xd6   : > { %v1067_v44 = vpop.permute.xlu1 %298  ;;  %v249_v48 = vpop.permute.xlu0 %248 }
  0xd7   : > { %v251_v26 = vmul.f32 %v249_v48, %v1041_v34  ;;  %v252_v27 = vmul.f32 %v249_v48, %v1049_v41  ;;  %v369_v34 = vrot.slane %v1084_v63, %v364_v19 }
  0xda   : > { %v254_v45 = vpop.permute.xlu1 %253 }
  0xdb   : > { %v274_v51 = vpop.permute.xlu0 %273 }
  0xde   : > { %v281_v46 = vpop.permute.xlu1 %280 }
  0xe0   : > { %v1069_v54 = vpop.permute.xlu0 %323 }
  0xe2   : > { %v306_v47 = vpop.permute.xlu1 %305 }
  0xe5   : > { %v1074_v57 = vpop.permute.xlu0 %348 }
  0xe6   : > { %v256_v49 = vpop.permute.xlu1 %255 }
  0xe7   : > { %v260_v5 = vsel %vm259_vm2, %v254_v45, %v256_v49  ;;  %v261_v6 = vsel %vm259_vm2, %v256_v49, %v254_v45  ;;  %v394_v49 = vrot.slane %v1084_v63, %v389_v20 }
  0xe8   : > { %v270_v14 = vmul.f32 %v265_v2, %v261_v6  ;;  %v271_v15 = vmul.f32 %v269_v3, %v260_v5 }
  0xea   : > { %v283_v50 = vpop.permute.xlu1 %282  ;;  %v1080_v61 = vpop.permute.xlu0 %373  ;;  %v276_v29 = vmul.f32 %v274_v51, %v270_v14  ;;  %v277_v30 = vmul.f32 %v274_v51, %v271_v15 }
  0xeb   : > { %v285_v12 = vsel %vm284_vm3, %v281_v46, %v283_v50  ;;  %v286_v13 = vsel %vm284_vm3, %v283_v50, %v281_v46  ;;  %v414_v50 = vsub.s32 7, %v1072_v56 }
  0xec   : > { %v295_v21 = vmul.f32 %v290_v8, %v286_v13  ;;  %v296_v22 = vmul.f32 %v294_v9, %v285_v12  ;;  %v279_v48 = vadd.f32 %v277_v30, %v252_v27 }
  0xed   : > { %v415_v8 = vrot.slane %v1082_v62, %v414_v50 }
  0xee   : > { %v308_v52 = vpop.permute.xlu1 %307  ;;  %v301_v38 = vmul.f32 %v1067_v44, %v295_v21  ;;  %v302_v39 = vmul.f32 %v1067_v44, %v296_v22  ;;  %v604_v21 = vld [vmem:[#allocation5 + $0x10] ss:$0 sm:$0xff] }
  0xef   : > { %v1095_v11 = vpop.permute.xlu0 %398  ;;  %v310_v23 = vsel %vm309_vm4, %v306_v47, %v308_v52  ;;  %v311_v24 = vsel %vm309_vm4, %v308_v52, %v306_v47  ;;  %v278_v47 = vadd.f32 %v276_v29, %v251_v26 }
  0xf0   : > { %v320_v35 = vmul.f32 %v315_v16, %v311_v24  ;;  %v321_v36 = vmul.f32 %v319_v17, %v310_v23 }
  0xf1   : > { %v303_v3 = vadd.f32 %v301_v38, %v278_v47 }
  0xf2   : > { %v331_v55 = vpop.permute.xlu1 %330  ;;  %v326_v44 = vmul.f32 %v1069_v54, %v320_v35  ;;  %v327_v51 = vmul.f32 %v1069_v54, %v321_v36  ;;  %v419_v54 = vrot.slane %v1084_v63, %v414_v50 }
  0xf4   : > { %v424_v33 = vpop.permute.xlu0 %423  ;;  %v328_v9 = vadd.f32 %v326_v44, %v303_v3 }
  0xf6   : > { %v333_v59 = vpop.permute.xlu1 %332 }
  0xf7   : > { %v335_v31 = vsel %vm334_vm5, %v331_v55, %v333_v59  ;;  %v336_v32 = vsel %vm334_vm5, %v333_v59, %v331_v55 }
  0xf8   : > { %v345_v42 = vmul.f32 %v340_v18, %v336_v32  ;;  %v346_v43 = vmul.f32 %v344_v28, %v335_v31 }
  0xf9   : > { %v449_v2 = vpop.permute.xlu0 %448 }
  0xfa   : > { %v356_v1 = vpop.permute.xlu1 %355  ;;  %v351_v4 = vmul.f32 %v1074_v57, %v345_v42  ;;  %v352_v5 = vmul.f32 %v1074_v57, %v346_v43 }
  0xfc   : > { %v353_v15 = vadd.f32 %v351_v4, %v328_v9 }
  0xfd   : > { %v431_v20 = vpop.permute.xlu0 %430 }
  0xfe   : > { %v358_v10 = vpop.permute.xlu1 %357 }
  0xff   : > { %v360_v45 = vsel %vm359_vm6, %v356_v1, %v358_v10  ;;  %v361_v46 = vsel %vm359_vm6, %v358_v10, %v356_v1  ;;  %v304_v1 = vadd.f32 %v302_v39, %v279_v48  ;;  %v861_v48 = vmov 1966171168  }
 0x100   : > { %v370_v59 = vmul.f32 %v365_v37, %v360_v45  ;;  %v371_v60 = vmul.f32 %v369_v34, %v361_v46 }
 0x101   : > { %v329_v10 = vadd.f32 %v327_v51, %v304_v1 }
 0x102   : > { %v381_v25 = vpop.permute.xlu1 %380  ;;  %v376_v12 = vmul.f32 %v1080_v61, %v370_v59  ;;  %v377_v13 = vmul.f32 %v1080_v61, %v371_v60  ;;  %v605_v61 = vld [vmem:[#allocation5 + $0x18] ss:$0 sm:$0xff] }
 0x103   : > { %v354_v16 = vadd.f32 %v352_v5, %v329_v10 }
 0x104   : > { %v378_v22 = vadd.f32 %v376_v12, %v353_v15 }
 0x105   : > { %v379_v23 = vadd.f32 %v377_v13, %v354_v16 }
 0x106   : > { %v383_v41 = vpop.permute.xlu1 %382 }
 0x107   : > { %v385_v52 = vsel %vm384_vm7, %v381_v25, %v383_v41  ;;  %v386_v55 = vsel %vm384_vm7, %v383_v41, %v381_v25 }
 0x108   : > { %v395_v6 = vmul.f32 %v390_v40, %v385_v52  ;;  %v396_v7 = vmul.f32 %v394_v49, %v386_v55  ;;  %v479_v49 = vunpack.c.l.s4 %v861_v48 }
 0x10a   : > { %v406_v0 = vpop.permute.xlu1 %405  ;;  %v401_v62 = vmul.f32 %v1095_v11, %v395_v6  ;;  %v402_v63 = vmul.f32 %v1095_v11, %v396_v7  ;;  %v480_v50 = vunpack.c.0.s8 %v479_v49 }
 0x10c   : > { %v403_v29 = vadd.f32 %v401_v62, %v378_v22  ;;  %v404_v30 = vadd.f32 %v402_v63, %v379_v23  ;;  %v483_v51 = vsub.s32 %v480_v50, %v1072_v56 }
 0x10e   : > { %v408_v14 = vpop.permute.xlu1 %407 }
 0x10f   : > { %v410_v57 = vsel %vm409_vm8, %v406_v0, %v408_v14  ;;  %v411_v17 = vsel %vm409_vm8, %v408_v14, %v406_v0 }
 0x110   : > { %v420_v18 = vmul.f32 %v415_v8, %v410_v57  ;;  %v421_v19 = vmul.f32 %v419_v54, %v411_v17 }
 0x112   : > { %v426_v24 = vmul.f32 %v424_v33, %v420_v18  ;;  %v427_v25 = vmul.f32 %v424_v33, %v421_v19  ;;  %v433_v26 = vpop.permute.xlu1 %432 }
 0x113   : > { %v435_v27 = vsel %vm434_vm9, %v431_v20, %v433_v26  ;;  %v436_v28 = vsel %vm434_vm9, %v433_v26, %v431_v20 }
 0x114   : > { %v445_v31 = vmul.f32 %v604_v21, %v435_v27  ;;  %v446_v11 = vmul.f32 %v605_v61, %v436_v28  ;;  %v428_v32 = vadd.f32 %v426_v24, %v403_v29  ;;  %v429_v35 = vadd.f32 %v427_v25, %v404_v30 }
 0x116   : > { %v451_v36 = vmul.f32 %v449_v2, %v445_v31  ;;  %v452_v37 = vmul.f32 %v449_v2, %v446_v11 }
 0x118   : > { %v453_v34 = vadd.f32 %v451_v36, %v428_v32  ;;  %v454_v38 = vadd.f32 %v452_v37, %v429_v35 }
 0x11a   : > { %v457_v39 = vrot.slane %v453_v34, 1  ;;  %v458_v40 = vrot.slane %v454_v38, 1 }
 0x11c   : > { %v461_v33 = vadd.f32 %v457_v39, %v453_v34  ;;  %v462_v41 = vadd.f32 %v458_v40, %v454_v38 }
 0x11e   : > { %v606_v42 = vmul.f32 -1.442695, %v461_v33  ;;  %v607_v43 = vmul.f32 -1.442695, %v462_v41 }
 0x120   : > { %702 = vpow2.f32 %v606_v42 }
 0x121   : > { %704 = vpow2.f32 %v607_v43 }
 0x12a   : > { %v703_v58 = vpop.eup %702 }
 0x12b   : > { %v705_v45 = vpop.eup %704  ;;  %v469_v46 = vadd.f32 1.0, %v703_v58 }
 0x12c   : > { %v470_v47 = vadd.f32 1.0, %v705_v45 }
 0x12d   : > { %706 = vrcp.f32 %v469_v46 }
 0x12e   : > { %708 = vrcp.f32 %v470_v47 }
 0x137   : > { %v707_v44 = vpop.eup %706 }
 0x138   : > { %v709_v52 = vpop.eup %708 }
 0x139   : > { %v477_v55 = vcombine.low %v707_v44, %v709_v52 }
 0x13b   : > { %v484_v59 = vrot.slane %v477_v55, %v483_v51 }
 0x13d   : > { %v491_v60 = vrot.slane %v484_v59, %v483_v51 }
 0x13f   : > { %497 = vst.msk [vmem:[%s201_s29] sm:$0x3] %vm495_vm10, %v491_v60 }
 0x140   : > { %781 = shalt.err (!%p778_p7)
}
 0x141   : > { %s782_s30 = scalar_lea.hbm %s1151_s7, 32  ;;  %s786_s8 = scalar_lea.hbm %s1198_s3, 64 }
 0x142   : > { %p783_p9 = scmp.ne.s32.totalorder %s1151_s7, %s782_s30  ;;  %p787_p0 = scmp.lt.u32.totalorder %s1151_s7, %s1198_s3 }
 0x143   : > { %p788_p1 = scmp.lt.u32.totalorder %s786_s8, %s782_s30  ;;  %p790_p4 = scmp.lt.u32.totalorder %s782_s30, %s1151_s7 }
 0x144   : > { %p784_p2 = pnand %p783_p9, %p974_p12 }
 0x145   : > { %p789_p11 = por %p788_p1, %p787_p0 }
 0x146   : > { %p785_p5 = pneg %p784_p2 }
 0x147   : > { %p791_p6 = por %p790_p4, %p789_p11 }
 0x149   : > { %p792_p8 = pnand %p791_p6, %p785_p5 }
 0x14b   : > { %795 = shalt.err (!%p792_p8)
}
 0x14c   : > { %621 = dma.vmem_to_hbm [thread:$0]  (%p974_p12), %s1153_s23, 32, %s1151_s7, %s499_s20  }
 0x14d PF: > { %s525_s11 = sand.u32 1, %s826_s12   ;;  %p1213_p10 = scmp.ne.s32.totalorder %s1203_s19, 0 }
 0x14e   : > { %p1214_p13 = scmp.ge.s32.totalorder %s838_s15, 2  ;;  %s526_s27 = scalar_lea.sflag [#allocation4], %s525_s11 }
 0x150   : > { %p632_p3 = pnand %p1214_p13, %p1213_p10 }
 0x152   : > { %821 = dma.done.wait (!%p632_p3), %s526_s27, 32  }
 0x153   : > { %823 = vsyncadd (!%p632_p3), %s526_s27, 4294967264  ;;  %p17_p7 = scmp.ge.s32.totalorder %s939_s24, 4   ;;  %s1215_s12 = smov %s830_s13 }
 0x154   : > { %s1216_s13 = smov %s834_s14  ;;  %s1217_s14 = smov %s970_s17 }
 0x155   : > { %s1218_s15 = smov %s939_s24  ;;  %19 = sbr.rel (!%p17_p7) target bundleno = 6 (0x6), region = 81 }
 0x15c   :  { %531 = vsyncpa [#allocation3], 1 }
 0x15d   :  { %533 = vsyncpa [#allocation3 + $0x1], 1 }
 0x15e   :  { %534 = vsyncpa [#allocation6], 1 }
 0x15f   :  { %535 = vsyncpa [#allocation4], 1 }
 0x160   :  { %537 = vsyncpa [#allocation4 + $0x1], 1 }

</bundles_post_ra>
